<compile_context>
chip_gen: v6e
topology: v6e:2x2x1
jax: 0.10.0
libtpu: 0.0.40
codegen_flags: <defaults>
</compile_context>

<pallas_src>
import jax
import jax.numpy as jnp
from jax.experimental import pallas as pl
from jax.experimental.pallas import tpu as pltpu

_LANE = 128
_SUBLANE = 8


def _round_up(x, m):
    return ((x + m - 1) // m) * m


def _policy_kernel(x_ref, w1_ref, b1_ref, w2_ref, b2_ref, o_ref):
    """One batch tile: x(TM,Din) @ w1(Din,Hp) -> ReLU -> @ w2(Hp,Op) -> softmax."""
    # In-kernel cast of the streamed activations to the (possibly bf16) MXU
    # operand dtype -- avoids an extra un-fused HBM pass in the wrapper.
    x = x_ref[...].astype(w1_ref.dtype)

    # Linear 1 + ReLU (MXU matmul, f32 accumulation).  Padded hidden lanes of
    # w1/b1 are zero, so they remain exactly 0 after the ReLU.
    h = jnp.dot(x, w1_ref[...], preferred_element_type=jnp.float32)
    h = jnp.maximum(h + b1_ref[...], 0.0)

    # Linear 2.  Padded output lanes of b2 hold -1e30 (mask folded into bias),
    # so their logits are hugely negative and exp() underflows to exactly 0.
    logits = jnp.dot(h.astype(w2_ref.dtype), w2_ref[...],
                     preferred_element_type=jnp.float32)
    logits = logits + b2_ref[...]

    # Numerically stable softmax along dim=1 (last axis).  Exact division so
    # every row sums to 1 to f32 precision (approx reciprocal was only ~1e-3).
    m = jnp.max(logits, axis=-1, keepdims=True)
    e = jnp.exp(logits - m)
    denom = jnp.sum(e, axis=-1, keepdims=True)
    o_ref[...] = (e / denom).astype(o_ref.dtype)


def prepare_params(w1, b1, w2, b2, *, compute_dtype=jnp.bfloat16):
    """One-time parameter prep (call once, reuse across forward calls).

    Pads hidden/output dims to the 128-lane width, folds the padded-output-lane
    mask into b2 (-1e30) and pre-casts the (tiny) weights to the MXU operand
    dtype.  Hoisting this out of the per-call path removes fixed per-call XLA
    latency that dominates small-batch inference.
    """
    w1 = jnp.asarray(w1, jnp.float32)
    b1 = jnp.asarray(b1, jnp.float32)
    w2 = jnp.asarray(w2, jnp.float32)
    b2 = jnp.asarray(b2, jnp.float32)
    D_in, H = w1.shape
    O = w2.shape[1]
    Hp = _round_up(H, _LANE)
    Op = _round_up(O, _LANE)

    w1p = jnp.zeros((D_in, Hp), jnp.float32).at[:, :H].set(w1).astype(compute_dtype)
    b1p = jnp.zeros((1, Hp), jnp.float32).at[0, :H].set(b1)
    w2p = jnp.zeros((Hp, Op), jnp.float32).at[:H, :O].set(w2).astype(compute_dtype)
    # Large finite negative bias on padded lanes => exp underflows to 0
    # (no inf-inf NaN hazard, no per-step masking ops inside the kernel).
    b2p = jnp.full((1, Op), -1e30, jnp.float32).at[0, :O].set(b2)
    return {"w1p": w1p, "b1p": b1p, "w2p": w2p, "b2p": b2p,
            "input_dim": D_in, "output_dim": O}


def policy_network_forward(state, params, *, block_batch=4096,
                           out_dtype=jnp.float32, unpad_output=True):
    """state: (B, input_dim) f32.  params: output of prepare_params().
    Returns (B, output_dim) probabilities (rows sum to 1)."""
    w1p, b1p, w2p, b2p = params["w1p"], params["b1p"], params["w2p"], params["b2p"]
    O = params["output_dim"]
    B, D_in = state.shape
    assert D_in == params["input_dim"]
    Hp = w1p.shape[1]
    Op = w2p.shape[1]
    compute_bytes = w1p.dtype.itemsize
    out_bytes = jnp.dtype(out_dtype).itemsize

    # Batch tile: big (amortizes per-grid-step overhead), a multiple of the 8
    # sublanes, and capped so large batches always give >= 2 grid steps -- the
    # "parallel" batch axis then shards across both v7x TensorCores.
    TM = min(block_batch, _round_up(B, _SUBLANE))
    TM = min(TM, max(_SUBLANE, _round_up(pl.cdiv(B, 2), _SUBLANE)))
    # Ragged final block is clipped by Pallas -> no wrapper-side jnp.pad pass
    # over the whole state array.
    grid = (pl.cdiv(B, TM),)

    # VMEM: double-buffered state/out tiles + resident (tiny) weights.  Set the
    # scoped limit explicitly with headroom (v5e default is only 16 MiB).
    vmem_needed = (2 * TM * D_in * state.dtype.itemsize
                   + 2 * TM * Op * out_bytes
                   + 2 * (D_in * Hp + Hp * Op) * compute_bytes
                   + 2 * (Hp + Op) * 4)
    vmem_limit = int(min(max(2 * vmem_needed, 16 << 20), 48 << 20))

    cost = pl.CostEstimate(
        flops=2 * B * (D_in * Hp + Hp * Op),
        transcendentals=B * Op,
        bytes_accessed=(B * D_in * state.dtype.itemsize
                        + (D_in * Hp + Hp * Op) * compute_bytes
                        + (Hp + Op) * 4
                        + B * Op * out_bytes),
    )

    out = pl.pallas_call(
        _policy_kernel,
        out_shape=jax.ShapeDtypeStruct((B, Op), out_dtype),
        grid_spec=pl.GridSpec(
            grid=grid,
            in_specs=[
                # state: blocked along batch, streamed tile-by-tile.
                pl.BlockSpec((TM, D_in), lambda i: (i, 0)),
                # weights / biases: full-array blocks with a constant block
                # index -> resident across the grid, not re-DMA'd per step.
                pl.BlockSpec((D_in, Hp), lambda i: (0, 0)),
                pl.BlockSpec((1, Hp), lambda i: (0, 0)),
                pl.BlockSpec((Hp, Op), lambda i: (0, 0)),
                pl.BlockSpec((1, Op), lambda i: (0, 0)),
            ],
            out_specs=pl.BlockSpec((TM, Op), lambda i: (i, 0)),
        ),
        compiler_params=pltpu.CompilerParams(
            dimension_semantics=("parallel",),
            vmem_limit_bytes=vmem_limit,
        ),
        cost_estimate=cost,
    )(state, w1p, b1p, w2p, b2p)

    # Padded output lanes hold exact zeros; slice them off only when the caller
    # needs the tight (B, output_dim) layout (the lane slice costs an extra
    # relayout pass over the output, so it is optional).
    return out[:, :O] if unpad_output else out


def init_params(key, input_dim, hidden_dim, output_dim):
    """Deterministic init mimicking nn.Linear's uniform(-1/sqrt(fan_in), +)."""
    k1, k2, k3, k4 = jax.random.split(key, 4)
    lim1 = 1.0 / jnp.sqrt(input_dim)
    lim2 = 1.0 / jnp.sqrt(hidden_dim)
    # Stored as (in, out) == transpose of PyTorch's (out, in) weight.
    w1 = jax.random.uniform(k1, (input_dim, hidden_dim), jnp.float32, -lim1, lim1)
    b1 = jax.random.uniform(k2, (hidden_dim,), jnp.float32, -lim1, lim1)
    w2 = jax.random.uniform(k3, (hidden_dim, output_dim), jnp.float32, -lim2, lim2)
    b2 = jax.random.uniform(k4, (output_dim,), jnp.float32, -lim2, lim2)
    return w1, b1, w2, b2


def _reference(state, w1, b1, w2, b2, compute_dtype=jnp.float32):
    """Pure-JAX reference with matching operand dtype (f32 accumulation)."""
    cd = compute_dtype
    h = jnp.dot(state.astype(cd), jnp.asarray(w1, cd),
                preferred_element_type=jnp.float32) + b1
    h = jnp.maximum(h, 0.0)
    logits = jnp.dot(h.astype(cd), jnp.asarray(w2, cd),
                     preferred_element_type=jnp.float32) + b2
    return jax.nn.softmax(logits, axis=1)


if __name__ == "__main__":
    key = jax.random.PRNGKey(0)
    input_dim, hidden_dim, output_dim = 16, 32, 4
    k_x, k_p, k_x2 = jax.random.split(key, 3)
    w1, b1, w2, b2 = init_params(k_p, input_dim, hidden_dim, output_dim)

    # --- small shape matching the module spec, exact f32 compute path ---
    params_f32 = prepare_params(w1, b1, w2, b2, compute_dtype=jnp.float32)
    batch = 8
    state = jax.random.normal(k_x, (batch, input_dim), jnp.float32)
    out = jax.block_until_ready(policy_network_forward(state, params_f32))
    ref = _reference(state, w1, b1, w2, b2)
    assert out.shape == (batch, output_dim)
    assert jnp.allclose(out, ref, atol=1e-4, rtol=1e-4)
    assert jnp.allclose(jnp.sum(out, axis=1), 1.0, atol=1e-4)

    # --- larger, non-aligned batch: default bf16 MXU-operand path, ragged
    #     final block (no wrapper-side batch pad), >= 2 grid steps ---
    params_bf16 = prepare_params(w1, b1, w2, b2)      # bf16 operands (default)
    batch2 = 1000
    state2 = jax.random.normal(k_x2, (batch2, input_dim), jnp.float32)
    out2 = jax.block_until_ready(
        policy_network_forward(state2, params_bf16, block_batch=4096))
    ref2_bf16 = _reference(state2, w1, b1, w2, b2, compute_dtype=jnp.bfloat16)
    ref2_f32 = _reference(state2, w1, b1, w2, b2)
    assert out2.shape == (batch2, output_dim)
    assert jnp.allclose(out2, ref2_bf16, atol=2e-3, rtol=2e-3)
    assert jnp.allclose(out2, ref2_f32, atol=2e-2, rtol=2e-2)
    assert jnp.allclose(jnp.sum(out2, axis=1), 1.0, atol=1e-3)

    print("KERNEL_OK")
</pallas_src>

<mosaic_0001>
module attributes {stable_mosaic.version = 11 : i64} {
  func.func @_policy_kernel(%arg0: i32, %arg1: memref<8x16xf32, #tpu.memory_space<vmem>>, %arg2: memref<16x128xf32, #tpu.memory_space<vmem>>, %arg3: memref<1x128xf32, #tpu.memory_space<vmem>>, %arg4: memref<128x128xf32, #tpu.memory_space<vmem>>, %arg5: memref<1x128xf32, #tpu.memory_space<vmem>>, %arg6: memref<8x128xf32, #tpu.memory_space<vmem>>) attributes {dimension_semantics = [#tpu.dimension_semantics<parallel>], iteration_bounds = array<i64: 1>, scalar_prefetch = 0 : i64, scratch_operands = 0 : i64, tpu.core_type = #tpu.core_type<tc>, window_params = [{transform_indices = @transform_0, window_bounds = array<i64: 8, 16>}, {pipeline_mode = #tpu.pipeline_mode<synchronous>, transform_indices = @transform_1, window_bounds = array<i64: 16, 128>}, {pipeline_mode = #tpu.pipeline_mode<synchronous>, transform_indices = @transform_2, window_bounds = array<i64: 1, 128>}, {pipeline_mode = #tpu.pipeline_mode<synchronous>, transform_indices = @transform_3, window_bounds = array<i64: 128, 128>}, {pipeline_mode = #tpu.pipeline_mode<synchronous>, transform_indices = @transform_4, window_bounds = array<i64: 1, 128>}, {transform_indices = @transform_5, window_bounds = array<i64: 8, 128>}]} {
    %c0 = arith.constant 0 : index
    %c0_0 = arith.constant 0 : index
    %0 = vector.load %arg1[%c0, %c0_0] : memref<8x16xf32, #tpu.memory_space<vmem>>, vector<8x16xf32>
    %c0_1 = arith.constant 0 : index
    %c0_2 = arith.constant 0 : index
    %1 = vector.load %arg2[%c0_1, %c0_2] : memref<16x128xf32, #tpu.memory_space<vmem>>, vector<16x128xf32>
    %cst = arith.constant dense<0.000000e+00> : vector<8x128xf32>
    %2 = tpu.matmul %0, %1, %cst {dimension_numbers = #tpu.dot_dimension_numbers<[1], [0], [0], [1], [0, 0, 1, 1], [], []>} : vector<8x16xf32>, vector<16x128xf32>, vector<8x128xf32> -> vector<8x128xf32>
    %c0_3 = arith.constant 0 : index
    %c0_4 = arith.constant 0 : index
    %3 = vector.load %arg3[%c0_3, %c0_4] : memref<1x128xf32, #tpu.memory_space<vmem>>, vector<1x128xf32>
    %4 = vector.broadcast %3 : vector<1x128xf32> to vector<8x128xf32>
    %5 = arith.addf %2, %4 : vector<8x128xf32>
    %cst_5 = arith.constant 0.000000e+00 : f32
    %6 = vector.broadcast %cst_5 : f32 to vector<8x128xf32>
    %7 = arith.maximumf %5, %6 : vector<8x128xf32>
    %c0_6 = arith.constant 0 : index
    %c0_7 = arith.constant 0 : index
    %8 = vector.load %arg4[%c0_6, %c0_7] : memref<128x128xf32, #tpu.memory_space<vmem>>, vector<128x128xf32>
    %cst_8 = arith.constant dense<0.000000e+00> : vector<8x128xf32>
    %9 = tpu.matmul %7, %8, %cst_8 {dimension_numbers = #tpu.dot_dimension_numbers<[1], [0], [0], [1], [0, 0, 1, 1], [], []>} : vector<8x128xf32>, vector<128x128xf32>, vector<8x128xf32> -> vector<8x128xf32>
    %c0_9 = arith.constant 0 : index
    %c0_10 = arith.constant 0 : index
    %10 = vector.load %arg5[%c0_9, %c0_10] : memref<1x128xf32, #tpu.memory_space<vmem>>, vector<1x128xf32>
    %11 = vector.broadcast %10 : vector<1x128xf32> to vector<8x128xf32>
    %12 = arith.addf %9, %11 : vector<8x128xf32>
    %cst_11 = arith.constant dense<0xFF800000> : vector<8xf32>
    %13 = vector.multi_reduction <maximumf>, %12, %cst_11 [1] : vector<8x128xf32> to vector<8xf32>
    %14 = vector.shape_cast %13 : vector<8xf32> to vector<8x1xf32>
    %15 = vector.broadcast %14 : vector<8x1xf32> to vector<8x128xf32>
    %16 = arith.subf %12, %15 : vector<8x128xf32>
    %17 = math.exp %16 : vector<8x128xf32>
    %cst_12 = arith.constant dense<0.000000e+00> : vector<8xf32>
    %18 = vector.multi_reduction <add>, %17, %cst_12 [1] : vector<8x128xf32> to vector<8xf32>
    %19 = vector.shape_cast %18 : vector<8xf32> to vector<8x1xf32>
    %20 = vector.broadcast %19 : vector<8x1xf32> to vector<8x128xf32>
    %21 = arith.divf %17, %20 : vector<8x128xf32>
    %c0_13 = arith.constant 0 : index
    %c0_14 = arith.constant 0 : index
    %22 = vector.load %arg6[%c0_13, %c0_14] : memref<8x128xf32, #tpu.memory_space<vmem>>, vector<8x128xf32>
    tpu.vector_store %arg6[%c0_13, %c0_14], %21 {strides = array<i32>} : memref<8x128xf32, #tpu.memory_space<vmem>>, vector<8x128xf32>,
    return
  }
  func.func @transform_0(%arg0: i32) -> (i32, i32) {
    %c0_i32 = arith.constant 0 : i32
    %c0_i32_0 = arith.constant 0 : i32
    return %arg0, %c0_i32 : i32, i32
  }
  func.func @transform_1(%arg0: i32) -> (i32, i32) {
    %c0_i32 = arith.constant 0 : i32
    %c0_i32_0 = arith.constant 0 : i32
    %c0_i32_1 = arith.constant 0 : i32
    return %c0_i32, %c0_i32_0 : i32, i32
  }
  func.func @transform_2(%arg0: i32) -> (i32, i32) {
    %c0_i32 = arith.constant 0 : i32
    %c0_i32_0 = arith.constant 0 : i32
    %c0_i32_1 = arith.constant 0 : i32
    return %c0_i32, %c0_i32_0 : i32, i32
  }
  func.func @transform_3(%arg0: i32) -> (i32, i32) {
    %c0_i32 = arith.constant 0 : i32
    %c0_i32_0 = arith.constant 0 : i32
    %c0_i32_1 = arith.constant 0 : i32
    return %c0_i32, %c0_i32_0 : i32, i32
  }
  func.func @transform_4(%arg0: i32) -> (i32, i32) {
    %c0_i32 = arith.constant 0 : i32
    %c0_i32_0 = arith.constant 0 : i32
    %c0_i32_1 = arith.constant 0 : i32
    return %c0_i32, %c0_i32_0 : i32, i32
  }
  func.func @transform_5(%arg0: i32) -> (i32, i32) {
    %c0_i32 = arith.constant 0 : i32
    %c0_i32_0 = arith.constant 0 : i32
    return %arg0, %c0_i32 : i32, i32
  }
}

</mosaic_0001>

<bundles_post_ra>
// kernel: tpu_custom_call.1
= control target key start
LH: loop header
LB: loop body
LE: loop exit
PB: predicated region body
PF: predicated region fallthrough
CT: control target
= control target key end

     0   :  { %10 = vsyncpa [#allocation3], 0  ;;  %s483_s0 = inlined_call_operand.hbm [shape: f32[8,16], index: 0, kind: input, shape index: {}]   ;;  %s484_s1 = inlined_call_operand.hbm [shape: f32[16,128], index: 1, kind: input, shape index: {}]   ;;  %s485_s2 = inlined_call_operand.vmem [shape: f32[1,128], index: 2, kind: input, shape index: {}]   ;;  %s486_s3 = inlined_call_operand.hbm [shape: f32[128,128], index: 3, kind: input, shape index: {}]   ;;  %s487_s4 = inlined_call_operand.vmem [shape: f32[1,128], index: 4, kind: input, shape index: {}]   ;;  %s488_s5 = inlined_call_operand.hbm [shape: f32[8,128], index: 5, kind: output, shape index: {}]  }
   0x1   :  { %11 = vsyncpa [#allocation6], 0 }
   0x2   :  { %12 = vsyncpa [#allocation4], 0  ;;  %s427_s18 = smov [#allocation5]  }
   0x3   :  { %s28_s19 = sshll.u32 %s427_s18, 4  ;;  %s29_s19 = int_to_ptr.vmem [resolvable:$true] %s28_s19 }
   0x4   :  { %s349_s20 = scalar_lea.vmem %s29_s19, 256  ;;  %p354_p1 = scmp.lt.s32.totalorder %s29_s19, %s29_s19 }
   0x5   :  { %p350_p0 = scmp.ne.s32.totalorder %s29_s19, %s349_s20  ;;  %p355_p2 = scmp.lt.s32.totalorder %s349_s20, %s349_s20 }
   0x7   :  { %p356_p3 = por %p355_p2, %p354_p1 }
   0x9   :  { %p357_p4 = pnand %p356_p3, %p350_p0 }
   0xb   :  { %360 = shalt.err (!%p357_p4)
}
   0xc   :  { %s428_s21 = smov 128   ;;  %s429_s22 = smov 8  }
   0xd   :  { %34 = dma.hbm_to_vmem [thread:$0]  %s484_s1, 256, %s29_s19, [#allocation6], %s428_s21, %s428_s21, %s429_s22  }
   0xe   :  { %s430_s25 = smov [#allocation2]   ;;  %s431_s27 = smov [#allocation7]  }
   0xf   :  { %s19_s26 = sshll.u32 %s430_s25, 4  ;;  %s42_s28 = sshll.u32 %s431_s27, 4  ;;  %s20_s26 = int_to_ptr.vmem [resolvable:$true] %s19_s26  ;;  %s43_s28 = int_to_ptr.vmem [resolvable:$true] %s42_s28 }
  0x10   :  { %s369_s29 = scalar_lea.vmem %s20_s26, 128  ;;  %p374_p6 = scmp.lt.s32.totalorder %s20_s26, %s20_s26 }
  0x11   :  { %p370_p5 = scmp.ne.s32.totalorder %s20_s26, %s369_s29  ;;  %p375_p7 = scmp.lt.s32.totalorder %s369_s29, %s369_s29 }
  0x13   :  { %p376_p8 = por %p375_p7, %p374_p6 }
  0x15   :  { %p377_p9 = pnand %p376_p8, %p370_p5 }
  0x17   :  { %380 = shalt.err (!%p377_p9)
}
  0x18   :  { %22 = dma.hbm_to_vmem [thread:$0]  %s483_s0, 128, %s20_s26, [#allocation3]  }
  0x19   :  { %s389_s7 = scalar_lea.vmem %s43_s28, 2048  ;;  %p394_p11 = scmp.lt.s32.totalorder %s43_s28, %s43_s28 }
  0x1a   :  { %p390_p10 = scmp.ne.s32.totalorder %s43_s28, %s389_s7  ;;  %p395_p12 = scmp.lt.s32.totalorder %s389_s7, %s389_s7 }
  0x1c   :  { %p396_p13 = por %p395_p12, %p394_p11 }
  0x1e   :  { %p397_p0 = pnand %p396_p13, %p390_p10 }
  0x20   :  { %400 = shalt.err (!%p397_p0)
}
  0x21   :  { %48 = dma.hbm_to_vmem [thread:$0]  %s486_s3, 2048, %s43_s28, [#allocation6], %s428_s21, %s428_s21, %s429_s22  }
  0x22   :  { %421 = dma.done.wait [#allocation3], 128  }
  0x23   :  { %422 = vsyncadd [#allocation3], 4294967168 }
  0x24   :  { %423 = dma.done.wait [#allocation6], 2304  }
  0x25   :  { %424 = vsyncadd [#allocation6], 4294964992  ;;  %v432_v0 = vmov 0.0   ;;  %vm433_vm0 = vmmov 0   ;;  %v62_v1 = vld [vmem:[#allocation5 + $0x8] sm:$0xff]  ;;  %v61_v2 = vld [vmem:[#allocation5] sm:$0xff] }
  0x26   :  { %287 = vmatprep.subr.mxu0 %v432_v0  ;;  %291 = vmatprep.mubr.msk.f32.mxu0 %vm433_vm0, %v432_v0  ;;  %v60_v3 = vld [vmem:[#allocation2] sm:$0xff]  ;;  %vm70_vm1 = vcmask 130048   ;;  %v160_v4 = vld [vmem:[#allocation7 + $0x78] sm:$0xff]  ;;  %v159_v5 = vld [vmem:[#allocation7 + $0x70] sm:$0xff] }
  0x27   :  { %294 = vmatprep.subr.mxu1 %v432_v0  ;;  %326 = vmatprep.mubr.msk.f32.mxu1 %vm433_vm0, %v432_v0  ;;  %v158_v6 = vld [vmem:[#allocation7 + $0x68] sm:$0xff]  ;;  %v157_v7 = vld [vmem:[#allocation7 + $0x60] sm:$0xff]  ;;  %v156_v8 = vld [vmem:[#allocation7 + $0x58] sm:$0xff] }
  0x28   :  { %288 = vmatpush3.msra.mxu0 %v62_v1  ;;  %295 = vmatpush3.msra.mxu1 %v160_v4  ;;  %v155_v9 = vld [vmem:[#allocation7 + $0x50] sm:$0xff]  ;;  %v154_v10 = vld [vmem:[#allocation7 + $0x48] sm:$0xff]  ;;  %v153_v11 = vld [vmem:[#allocation7 + $0x40] sm:$0xff] }
  0x29   :  { %289 = vmatprep.subr.mxu0 %v432_v0  ;;  %296 = vmatprep.subr.mxu1 %v432_v0  ;;  %v152_v12 = vld [vmem:[#allocation7 + $0x38] sm:$0xff]  ;;  %v151_v13 = vld [vmem:[#allocation7 + $0x30] sm:$0xff]  ;;  %v150_v14 = vld [vmem:[#allocation7 + $0x28] sm:$0xff] }
  0x2a   :  { %290 = vmatpush3.msra.mxu0 %v61_v2  ;;  %297 = vmatpush3.msra.mxu1 %v159_v5  ;;  %v149_v15 = vld [vmem:[#allocation7 + $0x20] sm:$0xff]  ;;  %v148_v16 = vld [vmem:[#allocation7 + $0x18] sm:$0xff]  ;;  %v147_v17 = vld [vmem:[#allocation7 + $0x10] sm:$0xff] }
  0x2b   :  { %292 = vmatmul.mubr.msk.f32.vlgmr.msra.gmra.mxu0 %vm70_vm1, %v60_v3  ;;  %298 = vmatprep.subr.mxu1 %v432_v0  ;;  %v146_v18 = vld [vmem:[#allocation7 + $0x8] sm:$0xff]  ;;  %v145_v19 = vld [vmem:[#allocation7] sm:$0xff] }
  0x2c   :  { %299 = vmatpush3.msra.mxu1 %v158_v6  ;;  %v264_v20 = vld [vmem:[%s485_s2] ss:$0 sm:$0xff]  ;;  %s434_s2 = smov [#allocation8]  }
  0x2d   :  { %300 = vmatprep.subr.mxu1 %v432_v0  ;;  %v266_v25 = vld [vmem:[%s487_s4] ss:$0 sm:$0xff]  ;;  %s254_s11 = sshll.u32 %s434_s2, 4  ;;  %s255_s11 = int_to_ptr.vmem [resolvable:$true] %s254_s11 }
  0x2e   :  { %301 = vmatpush3.msra.mxu1 %v157_v7  ;;  %s401_s12 = scalar_lea.vmem %s255_s11, 128  ;;  %p406_p2 = scmp.lt.s32.totalorder %s255_s11, %s255_s11 }
  0x2f   :  { %302 = vmatprep.subr.mxu1 %v432_v0  ;;  %p402_p1 = scmp.ne.s32.totalorder %s255_s11, %s401_s12  ;;  %p407_p3 = scmp.lt.s32.totalorder %s401_s12, %s401_s12 }
  0x30   :  { %303 = vmatpush3.msra.mxu1 %v156_v8 }
  0x31   :  { %304 = vmatprep.subr.mxu1 %v432_v0  ;;  %p408_p4 = por %p407_p3, %p406_p2 }
  0x32   :  { %305 = vmatpush3.msra.mxu1 %v155_v9 }
  0x33   :  { %306 = vmatprep.subr.mxu1 %v432_v0  ;;  %p409_p5 = pnand %p408_p4, %p402_p1 }
  0x34   :  { %307 = vmatpush3.msra.mxu1 %v154_v10 }
  0x35   :  { %308 = vmatprep.subr.mxu1 %v432_v0 }
  0x36   :  { %309 = vmatpush3.msra.mxu1 %v153_v11 }
  0x37   :  { %310 = vmatprep.subr.mxu1 %v432_v0 }
  0x38   :  { %311 = vmatpush3.msra.mxu1 %v152_v12 }
  0x39   :  { %312 = vmatprep.subr.mxu1 %v432_v0 }
  0x3a   :  { %313 = vmatpush3.msra.mxu1 %v151_v13 }
  0x3b   :  { %314 = vmatprep.subr.mxu1 %v432_v0 }
  0x3c   :  { %315 = vmatpush3.msra.mxu1 %v150_v14 }
  0x3d   :  { %316 = vmatprep.subr.mxu1 %v432_v0 }
  0x3e   :  { %317 = vmatpush3.msra.mxu1 %v149_v15 }
  0x3f   :  { %318 = vmatprep.subr.mxu1 %v432_v0 }
  0x40   :  { %319 = vmatpush3.msra.mxu1 %v148_v16 }
  0x41   :  { %320 = vmatprep.subr.mxu1 %v432_v0 }
  0x42   :  { %321 = vmatpush3.msra.mxu1 %v147_v17 }
  0x43   :  { %322 = vmatprep.subr.mxu1 %v432_v0 }
  0x44   :  { %323 = vmatpush3.msra.mxu1 %v146_v18 }
  0x45   :  { %324 = vmatprep.subr.mxu1 %v432_v0 }
  0x46   :  { %325 = vmatpush3.msra.mxu1 %v145_v19 }
  0xeb   :  { %v140_v21 = vpop.f32.mrf.mxu0 }
  0xec   :  { %v141_v22 = vadd.f32 %v264_v20, %v140_v21 }
  0xed   :  { %v293_v23 = vpop.f32.mrf.mxu0 }
  0xee   :  { %v144_v24 = vmax.f32 %v141_v22, 0.0 }
  0xf0   :  { %327 = vmatmul.mubr.f32.vlgmr.msra.gmra.mxu1 %v144_v24 }
 0x1b0   :  { %v234_v26 = vpop.f32.mrf.mxu1 }
 0x1b1   :  { %v235_v27 = vadd.f32 %v266_v25, %v234_v26 }
 0x1b2   :  { %v328_v28 = vpop.f32.mrf.mxu1 }
 0x1b3   :  { %238 = vmax.xlane.f32.xlu0 %v235_v27 }
 0x23c   :  { %v239_v29 = vpop.xlane.xlu0 %238 }
 0x23d   :  { %v240_v30 = vsub.f32 %v235_v27, %v239_v29 }
 0x23f   :  { %v241_v31 = vmul.f32 1.442695, %v240_v30 }
 0x241   :  { %337 = vpow2.f32 %v241_v31 }
 0x24e   :  { %v338_v32 = vpop.eup %337 }
 0x24f   :  { %243 = vadd.xlane.f32.xlu0 %v338_v32 }
 0x2d8   :  { %v244_v33 = vpop.xlane.xlu0 %243 }
 0x2d9   :  { %339 = vrcp.f32 %v244_v33 }
 0x2e6   :  { %v340_v34 = vpop.eup %339 }
 0x2e7   :  { %v246_v35 = vmul.f32 %v340_v34, %v338_v32 }
 0x2e9   :  { %247 = vst [vmem:[#allocation8] sm:$0xff] %v246_v35 }
 0x2ea   :  { %412 = shalt.err (!%p409_p5)
}
 0x2eb   :  { %257 = dma.vmem_to_hbm [thread:$0]  %s255_s11, 128, %s488_s5, [#allocation4]  }
 0x2ec   :  { %425 = dma.done.wait [#allocation4], 128  }
 0x2ed   :  { %426 = vsyncadd [#allocation4], 4294967168 }
 0x2ee   :  { %261 = vsyncpa [#allocation3], 1 }
 0x2ef   :  { %262 = vsyncpa [#allocation6], 1 }
 0x2f0   :  { %263 = vsyncpa [#allocation4], 1 }

</bundles_post_ra>
